<compile_context>
chip_gen: v7x
topology: tpu7x:2x2x1
jax: 0.10.0
libtpu: 0.0.40
codegen_flags: <defaults>
</compile_context>

<pallas_src>
import string

import jax
import jax.numpy as jnp
from jax import lax
from jax.experimental import pallas as pl
from jax.experimental.pallas import tpu as pltpu

allowed_characters = string.ascii_letters + " .,;'" + "_"
N_LETTERS = len(allowed_characters)  # 58
N_HIDDEN = 128
N_CLASSES = 18  # e.g. number of language labels in data/names


def charrnn_kernel(x_ref, wih_ref, whh_ref, bh_ref, who_ref, bho_ref,
                   out_ref, xw_ref):
    """Whole forward pass in one kernel invocation (no grid).

    x_ref   : (L*B, I)  flattened one-hot inputs for the whole sequence
    wih_ref : (I, H)    input->hidden weight (pre-transposed)
    whh_ref : (H, H)    hidden->hidden weight (pre-transposed)
    bh_ref  : (1, H)    b_ih + b_hh (pre-summed)
    who_ref : (H, O)    hidden->output weight (pre-transposed)
    bho_ref : (1, O)
    out_ref : (B, O)    log-softmax output
    xw_ref  : (L*B, H)  VMEM scratch: hoisted input projection
    """
    LB, _ = x_ref.shape
    B, _ = out_ref.shape
    H = whh_ref.shape[0]
    L = LB // B

    # Hoisted input projection for ALL timesteps in one MXU pass (+ fused biases).
    xw_ref[...] = (jnp.dot(x_ref[...], wih_ref[...],
                           preferred_element_type=jnp.float32)
                   + bh_ref[...])

    whh = whh_ref[...]  # (H, H), resident for the whole recurrence

    def step(t, h):
        # h carried in vregs; only the precomputed xw row is loaded per step.
        row = pl.multiple_of(t * B, B)
        pre = xw_ref[pl.ds(row, B), :] + jnp.dot(
            h, whh, preferred_element_type=jnp.float32)
        return jnp.tanh(pre)

    h0 = jnp.zeros((B, H), jnp.float32)
    h = lax.fori_loop(0, L, step, h0, unroll=True)

    # h2o + log-softmax (O=18 < 128 lanes: single masked store, fires once -> negligible).
    logits = (jnp.dot(h, who_ref[...], preferred_element_type=jnp.float32)
              + bho_ref[...])
    z = logits - jnp.max(logits, axis=1, keepdims=True)
    out_ref[...] = z - jnp.log(jnp.sum(jnp.exp(z), axis=1, keepdims=True))


def char_rnn_forward(line_tensor, params):
    """line_tensor: (L, B, I) float32 one-hot. Returns (B, O) log-probs."""
    L, B, I = line_tensor.shape
    w_ih, w_hh, b_ih, b_hh, w_ho, b_ho = params
    H = w_hh.shape[0]
    O = w_ho.shape[0]

    # Glue: flatten timesteps, pre-transpose weights, pre-sum the recurrent biases.
    x2d = line_tensor.reshape(L * B, I)
    w_ih_t = w_ih.T                    # (I, H)
    w_hh_t = w_hh.T                    # (H, H)
    w_ho_t = w_ho.T                    # (H, O)
    b_h = (b_ih + b_hh).reshape(1, H)  # fused rnn biases
    b_o = b_ho.reshape(1, O)

    return pl.pallas_call(
        charrnn_kernel,
        out_shape=jax.ShapeDtypeStruct((B, O), jnp.float32),
        # No grid: every operand is a full-array VMEM resident, loaded exactly once.
        scratch_shapes=[pltpu.VMEM((L * B, H), jnp.float32)],
    )(x2d, w_ih_t, w_hh_t, b_h, w_ho_t, b_o)


def init_params(key, input_size, hidden_size, output_size):
    """Deterministic init matching the PyTorch parameter shapes."""
    ks = jax.random.split(key, 6)
    s = 1.0 / jnp.sqrt(hidden_size)
    w_ih = jax.random.uniform(ks[0], (hidden_size, input_size), jnp.float32, -s, s)
    w_hh = jax.random.uniform(ks[1], (hidden_size, hidden_size), jnp.float32, -s, s)
    b_ih = jax.random.uniform(ks[2], (hidden_size,), jnp.float32, -s, s)
    b_hh = jax.random.uniform(ks[3], (hidden_size,), jnp.float32, -s, s)
    w_ho = jax.random.uniform(ks[4], (output_size, hidden_size), jnp.float32, -s, s)
    b_ho = jax.random.uniform(ks[5], (output_size,), jnp.float32, -s, s)
    return (w_ih, w_hh, b_ih, b_hh, w_ho, b_ho)


def char_rnn_ref(line_tensor, params):
    """Pure-JAX reference mirroring torch nn.RNN + Linear + LogSoftmax."""
    w_ih, w_hh, b_ih, b_hh, w_ho, b_ho = params
    B = line_tensor.shape[1]
    H = w_hh.shape[0]
    h = jnp.zeros((B, H), jnp.float32)
    for t in range(line_tensor.shape[0]):
        x_t = line_tensor[t]
        h = jnp.tanh(x_t @ w_ih.T + b_ih + h @ w_hh.T + b_hh)
    logits = h @ w_ho.T + b_ho
    return jax.nn.log_softmax(logits, axis=1)


if __name__ == "__main__":
    key = jax.random.PRNGKey(0)
    k_in, k_par = jax.random.split(key)

    SEQ, BATCH = 8, 1  # lineToTensor produces batch=1
    # Deterministic one-hot "line" input, analogous to lineToTensor(...)
    idx = jax.random.randint(k_in, (SEQ,), 0, N_LETTERS)
    line_tensor = jax.nn.one_hot(idx, N_LETTERS, dtype=jnp.float32).reshape(
        SEQ, BATCH, N_LETTERS)

    params = init_params(k_par, N_LETTERS, N_HIDDEN, N_CLASSES)

    out = char_rnn_forward(line_tensor, params)
    out = jax.block_until_ready(out)

    ref = char_rnn_ref(line_tensor, params)
    assert out.shape == (BATCH, N_CLASSES)
    assert jnp.allclose(out, ref, atol=1e-4, rtol=1e-5), "mismatch vs reference"

    print("KERNEL_OK")
</pallas_src>

<mosaic_0001>
module attributes {stable_mosaic.version = 11 : i64} {
  func.func @charrnn_kernel(%arg0: memref<8x58xf32, #tpu.memory_space<vmem>>, %arg1: memref<58x128xf32, #tpu.memory_space<vmem>>, %arg2: memref<128x128xf32, #tpu.memory_space<vmem>>, %arg3: memref<1x128xf32, #tpu.memory_space<vmem>>, %arg4: memref<128x18xf32, #tpu.memory_space<vmem>>, %arg5: memref<1x18xf32, #tpu.memory_space<vmem>>, %arg6: memref<1x18xf32, #tpu.memory_space<vmem>>, %arg7: memref<8x128xf32, #tpu.memory_space<vmem>>) attributes {dimension_semantics = [], scalar_prefetch = 0 : i64, scratch_operands = 1 : i64, tpu.core_type = #tpu.core_type<tc>} {
    %c0 = arith.constant 0 : index
    %c0_0 = arith.constant 0 : index
    %0 = vector.load %arg0[%c0, %c0_0] : memref<8x58xf32, #tpu.memory_space<vmem>>, vector<8x58xf32>
    %c0_1 = arith.constant 0 : index
    %c0_2 = arith.constant 0 : index
    %1 = vector.load %arg1[%c0_1, %c0_2] : memref<58x128xf32, #tpu.memory_space<vmem>>, vector<58x128xf32>
    %cst = arith.constant dense<0.000000e+00> : vector<8x128xf32>
    %2 = tpu.matmul %0, %1, %cst {dimension_numbers = #tpu.dot_dimension_numbers<[1], [0], [0], [1], [0, 0, 1, 1], [], []>} : vector<8x58xf32>, vector<58x128xf32>, vector<8x128xf32> -> vector<8x128xf32>
    %c0_3 = arith.constant 0 : index
    %c0_4 = arith.constant 0 : index
    %3 = vector.load %arg3[%c0_3, %c0_4] : memref<1x128xf32, #tpu.memory_space<vmem>>, vector<1x128xf32>
    %4 = vector.broadcast %3 : vector<1x128xf32> to vector<8x128xf32>
    %5 = arith.addf %2, %4 : vector<8x128xf32>
    %c0_5 = arith.constant 0 : index
    %c0_6 = arith.constant 0 : index
    %6 = vector.load %arg7[%c0_5, %c0_6] : memref<8x128xf32, #tpu.memory_space<vmem>>, vector<8x128xf32>
    tpu.vector_store %arg7[%c0_5, %c0_6], %5 {strides = array<i32>} : memref<8x128xf32, #tpu.memory_space<vmem>>, vector<8x128xf32>,
    %c0_7 = arith.constant 0 : index
    %c0_8 = arith.constant 0 : index
    %7 = vector.load %arg2[%c0_7, %c0_8] : memref<128x128xf32, #tpu.memory_space<vmem>>, vector<128x128xf32>
    %cst_9 = arith.constant 0.000000e+00 : f32
    %8 = vector.broadcast %cst_9 : f32 to vector<1x128xf32>
    %c0_i32 = arith.constant 0 : i32
    %c1_i32 = arith.constant 1 : i32
    %9 = arith.muli %c0_i32, %c1_i32 : i32
    %10 = tpu.assume_multiple %9, 1 : i32
    %11 = arith.index_cast %10 : i32 to index
    %c0_10 = arith.constant 0 : index
    %12 = vector.load %arg7[%11, %c0_10] : memref<8x128xf32, #tpu.memory_space<vmem>>, vector<1x128xf32>
    %cst_11 = arith.constant dense<0.000000e+00> : vector<1x128xf32>
    %13 = tpu.matmul %8, %7, %cst_11 {dimension_numbers = #tpu.dot_dimension_numbers<[1], [0], [0], [1], [0, 0, 1, 1], [], []>} : vector<1x128xf32>, vector<128x128xf32>, vector<1x128xf32> -> vector<1x128xf32>
    %14 = arith.addf %12, %13 : vector<1x128xf32>
    %15 = math.tanh %14 : vector<1x128xf32>
    %c1_i32_12 = arith.constant 1 : i32
    %c1_i32_13 = arith.constant 1 : i32
    %16 = arith.muli %c1_i32_12, %c1_i32_13 : i32
    %17 = tpu.assume_multiple %16, 1 : i32
    %18 = arith.index_cast %17 : i32 to index
    %c0_14 = arith.constant 0 : index
    %19 = vector.load %arg7[%18, %c0_14] : memref<8x128xf32, #tpu.memory_space<vmem>>, vector<1x128xf32>
    %cst_15 = arith.constant dense<0.000000e+00> : vector<1x128xf32>
    %20 = tpu.matmul %15, %7, %cst_15 {dimension_numbers = #tpu.dot_dimension_numbers<[1], [0], [0], [1], [0, 0, 1, 1], [], []>} : vector<1x128xf32>, vector<128x128xf32>, vector<1x128xf32> -> vector<1x128xf32>
    %21 = arith.addf %19, %20 : vector<1x128xf32>
    %22 = math.tanh %21 : vector<1x128xf32>
    %c2_i32 = arith.constant 2 : i32
    %c1_i32_16 = arith.constant 1 : i32
    %23 = arith.muli %c2_i32, %c1_i32_16 : i32
    %24 = tpu.assume_multiple %23, 1 : i32
    %25 = arith.index_cast %24 : i32 to index
    %c0_17 = arith.constant 0 : index
    %26 = vector.load %arg7[%25, %c0_17] : memref<8x128xf32, #tpu.memory_space<vmem>>, vector<1x128xf32>
    %cst_18 = arith.constant dense<0.000000e+00> : vector<1x128xf32>
    %27 = tpu.matmul %22, %7, %cst_18 {dimension_numbers = #tpu.dot_dimension_numbers<[1], [0], [0], [1], [0, 0, 1, 1], [], []>} : vector<1x128xf32>, vector<128x128xf32>, vector<1x128xf32> -> vector<1x128xf32>
    %28 = arith.addf %26, %27 : vector<1x128xf32>
    %29 = math.tanh %28 : vector<1x128xf32>
    %c3_i32 = arith.constant 3 : i32
    %c1_i32_19 = arith.constant 1 : i32
    %30 = arith.muli %c3_i32, %c1_i32_19 : i32
    %31 = tpu.assume_multiple %30, 1 : i32
    %32 = arith.index_cast %31 : i32 to index
    %c0_20 = arith.constant 0 : index
    %33 = vector.load %arg7[%32, %c0_20] : memref<8x128xf32, #tpu.memory_space<vmem>>, vector<1x128xf32>
    %cst_21 = arith.constant dense<0.000000e+00> : vector<1x128xf32>
    %34 = tpu.matmul %29, %7, %cst_21 {dimension_numbers = #tpu.dot_dimension_numbers<[1], [0], [0], [1], [0, 0, 1, 1], [], []>} : vector<1x128xf32>, vector<128x128xf32>, vector<1x128xf32> -> vector<1x128xf32>
    %35 = arith.addf %33, %34 : vector<1x128xf32>
    %36 = math.tanh %35 : vector<1x128xf32>
    %c4_i32 = arith.constant 4 : i32
    %c1_i32_22 = arith.constant 1 : i32
    %37 = arith.muli %c4_i32, %c1_i32_22 : i32
    %38 = tpu.assume_multiple %37, 1 : i32
    %39 = arith.index_cast %38 : i32 to index
    %c0_23 = arith.constant 0 : index
    %40 = vector.load %arg7[%39, %c0_23] : memref<8x128xf32, #tpu.memory_space<vmem>>, vector<1x128xf32>
    %cst_24 = arith.constant dense<0.000000e+00> : vector<1x128xf32>
    %41 = tpu.matmul %36, %7, %cst_24 {dimension_numbers = #tpu.dot_dimension_numbers<[1], [0], [0], [1], [0, 0, 1, 1], [], []>} : vector<1x128xf32>, vector<128x128xf32>, vector<1x128xf32> -> vector<1x128xf32>
    %42 = arith.addf %40, %41 : vector<1x128xf32>
    %43 = math.tanh %42 : vector<1x128xf32>
    %c5_i32 = arith.constant 5 : i32
    %c1_i32_25 = arith.constant 1 : i32
    %44 = arith.muli %c5_i32, %c1_i32_25 : i32
    %45 = tpu.assume_multiple %44, 1 : i32
    %46 = arith.index_cast %45 : i32 to index
    %c0_26 = arith.constant 0 : index
    %47 = vector.load %arg7[%46, %c0_26] : memref<8x128xf32, #tpu.memory_space<vmem>>, vector<1x128xf32>
    %cst_27 = arith.constant dense<0.000000e+00> : vector<1x128xf32>
    %48 = tpu.matmul %43, %7, %cst_27 {dimension_numbers = #tpu.dot_dimension_numbers<[1], [0], [0], [1], [0, 0, 1, 1], [], []>} : vector<1x128xf32>, vector<128x128xf32>, vector<1x128xf32> -> vector<1x128xf32>
    %49 = arith.addf %47, %48 : vector<1x128xf32>
    %50 = math.tanh %49 : vector<1x128xf32>
    %c6_i32 = arith.constant 6 : i32
    %c1_i32_28 = arith.constant 1 : i32
    %51 = arith.muli %c6_i32, %c1_i32_28 : i32
    %52 = tpu.assume_multiple %51, 1 : i32
    %53 = arith.index_cast %52 : i32 to index
    %c0_29 = arith.constant 0 : index
    %54 = vector.load %arg7[%53, %c0_29] : memref<8x128xf32, #tpu.memory_space<vmem>>, vector<1x128xf32>
    %cst_30 = arith.constant dense<0.000000e+00> : vector<1x128xf32>
    %55 = tpu.matmul %50, %7, %cst_30 {dimension_numbers = #tpu.dot_dimension_numbers<[1], [0], [0], [1], [0, 0, 1, 1], [], []>} : vector<1x128xf32>, vector<128x128xf32>, vector<1x128xf32> -> vector<1x128xf32>
    %56 = arith.addf %54, %55 : vector<1x128xf32>
    %57 = math.tanh %56 : vector<1x128xf32>
    %c7_i32 = arith.constant 7 : i32
    %c1_i32_31 = arith.constant 1 : i32
    %58 = arith.muli %c7_i32, %c1_i32_31 : i32
    %59 = tpu.assume_multiple %58, 1 : i32
    %60 = arith.index_cast %59 : i32 to index
    %c0_32 = arith.constant 0 : index
    %61 = vector.load %arg7[%60, %c0_32] : memref<8x128xf32, #tpu.memory_space<vmem>>, vector<1x128xf32>
    %cst_33 = arith.constant dense<0.000000e+00> : vector<1x128xf32>
    %62 = tpu.matmul %57, %7, %cst_33 {dimension_numbers = #tpu.dot_dimension_numbers<[1], [0], [0], [1], [0, 0, 1, 1], [], []>} : vector<1x128xf32>, vector<128x128xf32>, vector<1x128xf32> -> vector<1x128xf32>
    %63 = arith.addf %61, %62 : vector<1x128xf32>
    %64 = math.tanh %63 : vector<1x128xf32>
    %c8_i32 = arith.constant 8 : i32
    %c0_34 = arith.constant 0 : index
    %c0_35 = arith.constant 0 : index
    %65 = vector.load %arg4[%c0_34, %c0_35] : memref<128x18xf32, #tpu.memory_space<vmem>>, vector<128x18xf32>
    %cst_36 = arith.constant dense<0.000000e+00> : vector<1x18xf32>
    %66 = tpu.matmul %64, %65, %cst_36 {dimension_numbers = #tpu.dot_dimension_numbers<[1], [0], [0], [1], [0, 0, 1, 1], [], []>} : vector<1x128xf32>, vector<128x18xf32>, vector<1x18xf32> -> vector<1x18xf32>
    %c0_37 = arith.constant 0 : index
    %c0_38 = arith.constant 0 : index
    %67 = vector.load %arg5[%c0_37, %c0_38] : memref<1x18xf32, #tpu.memory_space<vmem>>, vector<1x18xf32>
    %68 = arith.addf %66, %67 : vector<1x18xf32>
    %cst_39 = arith.constant dense<0xFF800000> : vector<1xf32>
    %69 = vector.multi_reduction <maximumf>, %68, %cst_39 [1] : vector<1x18xf32> to vector<1xf32>
    %70 = vector.shape_cast %69 : vector<1xf32> to vector<1x1xf32>
    %71 = vector.broadcast %70 : vector<1x1xf32> to vector<1x18xf32>
    %72 = arith.subf %68, %71 : vector<1x18xf32>
    %73 = math.exp %72 : vector<1x18xf32>
    %cst_40 = arith.constant dense<0.000000e+00> : vector<1xf32>
    %74 = vector.multi_reduction <add>, %73, %cst_40 [1] : vector<1x18xf32> to vector<1xf32>
    %75 = vector.shape_cast %74 : vector<1xf32> to vector<1x1xf32>
    %76 = math.log %75 : vector<1x1xf32>
    %77 = vector.broadcast %76 : vector<1x1xf32> to vector<1x18xf32>
    %78 = arith.subf %72, %77 : vector<1x18xf32>
    %c0_41 = arith.constant 0 : index
    %c0_42 = arith.constant 0 : index
    %79 = vector.load %arg6[%c0_41, %c0_42] : memref<1x18xf32, #tpu.memory_space<vmem>>, vector<1x18xf32>
    tpu.vector_store %arg6[%c0_41, %c0_42], %78 {strides = array<i32>} : memref<1x18xf32, #tpu.memory_space<vmem>>, vector<1x18xf32>,
    return
  }
}

</mosaic_0001>

<bundles_post_ra>
// kernel: tpu_custom_call.1
= control target key start
LH: loop header
LB: loop body
LE: loop exit
PB: predicated region body
PF: predicated region fallthrough
CT: control target
= control target key end

     0   :  { %11 = vsyncpa [#allocation4], 0  ;;  %s2012_s0 = inlined_call_operand.vmem [shape: f32[8,58], index: 0, kind: input, shape index: {}]   ;;  %s2013_s1 = inlined_call_operand.hbm [shape: f32[58,128], index: 1, kind: input, shape index: {}]   ;;  %s2014_s2 = inlined_call_operand.vmem [shape: f32[128,128], index: 2, kind: input, shape index: {}]   ;;  %s2015_s3 = inlined_call_operand.vmem [shape: f32[1,128], index: 3, kind: input, shape index: {}]   ;;  %s2016_s4 = inlined_call_operand.vmem [shape: f32[128,18], index: 4, kind: input, shape index: {}]   ;;  %s2017_s5 = inlined_call_operand.vmem [shape: f32[1,18], index: 5, kind: input, shape index: {}]   ;;  %s2018_s6 = inlined_call_operand.hbm [shape: f32[1,18], index: 6, kind: output, shape index: {}]  }
   0x1   :  { %12 = vsyncpa [#allocation5], 0  ;;  %s1660_s21 = smov [#allocation3]   ;;  %s1612_s25 = scalar_lea.hbm %s2013_s1, 1024 }
   0x2   :  { %s20_s22 = sshll.u32 %s1660_s21, 4  ;;  %p1613_p0 = scmp.ne.s32.totalorder %s2013_s1, %s1612_s25  ;;  %s21_s22 = int_to_ptr.vmem [resolvable:$true] %s20_s22 }
   0x3   :  { %p1616_p1 = scmp.lt.u32.totalorder %s1612_s25, %s2013_s1 }
   0x5   :  { %p1618_p2 = pnand %p1616_p1, %p1613_p0 }
   0x7   :  { %1621 = shalt.err (!%p1618_p2)
}
   0x8   :  { %s1622_s30 = scalar_lea.vmem %s21_s22, 1024  ;;  %p1627_p4 = scmp.lt.s32.totalorder %s21_s22, %s21_s22 }
   0x9   :  { %p1623_p3 = scmp.ne.s32.totalorder %s21_s22, %s1622_s30  ;;  %p1628_p5 = scmp.lt.s32.totalorder %s1622_s30, %s1622_s30 }
   0xb   :  { %p1629_p6 = por %p1628_p5, %p1627_p4 }
   0xd   :  { %p1630_p7 = pnand %p1629_p6, %p1623_p3 }
   0xf   :  { %1633 = shalt.err (!%p1630_p7)
}
  0x10   :  { %s1661_s7 = smov 128   ;;  %s1662_s8 = smov 8  }
  0x11   :  { %26 = dma.hbm_to_vmem [thread:$0]  %s2013_s1, 1024, %s21_s22, [#allocation4], %s1661_s7, %s1661_s7, %s1662_s8  }
  0x12   :  { %1656 = dma.done.wait [#allocation4], 1024  }
  0x13   :  { %1657 = vsyncadd [#allocation4], 4294966272  ;;  %v1663_v0 = vmov 0.0|0.0   ;;  %vm1664_vm0 = vmmov 0   ;;  %v1665_v1 = vmov 0.0   ;;  %v133_v2 = vld [vmem:[%s2014_s2] sm:$0xff] }
  0x14   :  { %1368 = vmatprep.subr.bf16.mxu1 %v1663_v0  ;;  %1355 = vmatprep.subr.bf16.mxu0 %v1663_v0  ;;  %v134_v3 = vld [vmem:[%s2014_s2 + $0x8] sm:$0xff]  ;;  %v135_v4 = vld [vmem:[%s2014_s2 + $0x10] sm:$0xff]  ;;  %v136_v6 = vld [vmem:[%s2014_s2 + $0x18] sm:$0xff]  ;;  %vm58_vm1 = vcmask 1041408   ;;  %vm1666_vm2 = vmmov 1   ;;  %vm54_vm4 = vcmask 474112  }
  0x15   :  { %1037 = vmatprep.mubr.msk.f32.mxu0 %vm1664_vm0, %v1665_v1  ;;  %1072 = vmatprep.mubr.msk.f32.mxu1 %vm1664_vm0, %v1665_v1  ;;  %v1730_v5 = vpack.c.bf16 %v134_v3, %v133_v2  ;;  %v39_v7 = vld [vmem:[#allocation3] sm:$0xff]  ;;  %v40_v8 = vld [vmem:[#allocation3 + $0x8] sm:$0xff]  ;;  %v41_v10 = vld [vmem:[#allocation3 + $0x10] sm:$0xff]  ;;  %v1736_v11 = vpack.c.bf16 %v136_v6, %v135_v4  ;;  %vm827_vm5 = vcmask 139264  }
  0x16   :  { %v1356_v9 = vpack.c.bf16 %v40_v8, %v39_v7  ;;  %v42_v12 = vld [vmem:[#allocation3 + $0x18] sm:$0xff]  ;;  %v138_v14 = vld [vmem:[%s2014_s2 + $0x28] sm:$0xff]  ;;  %v44_v17 = vld [vmem:[#allocation3 + $0x28] sm:$0xff] }
  0x17   :  { %1370 = vmatpush3.bf16.msra.mxu1 %v1730_v5  ;;  %v137_v13 = vld [vmem:[%s2014_s2 + $0x20] sm:$0xff]  ;;  %v1359_v15 = vpack.c.bf16 %v42_v12, %v41_v10  ;;  %v43_v16 = vld [vmem:[#allocation3 + $0x20] sm:$0xff]  ;;  %v139_v19 = vld [vmem:[%s2014_s2 + $0x30] sm:$0xff] }
  0x18   :  { %1371 = vmatprep.subr.bf16.mxu1 %v1663_v0  ;;  %1357 = vmatpush3.bf16.msra.mxu0 %v1356_v9  ;;  %v1747_v18 = vpack.c.bf16 %v138_v14, %v137_v13  ;;  %v140_v20 = vld [vmem:[%s2014_s2 + $0x38] sm:$0xff]  ;;  %v1362_v21 = vpack.c.bf16 %v44_v17, %v43_v16  ;;  %v46_v23 = vld [vmem:[#allocation3 + $0x38] sm:$0x3]  ;;  %v142_v26 = vld [vmem:[%s2014_s2 + $0x48] sm:$0xff] }
  0x19   :  { %1358 = vmatprep.subr.bf16.mxu0 %v1663_v0  ;;  %v45_v22 = vld [vmem:[#allocation3 + $0x30] sm:$0xff]  ;;  %v1758_v24 = vpack.c.bf16 %v140_v20, %v139_v19  ;;  %v141_v25 = vld [vmem:[%s2014_s2 + $0x40] sm:$0xff]  ;;  %vm1366_vm3 = vmpackc.low %vm58_vm1, %vm1666_vm2 }
  0x1a   :  { %v1365_v27 = vpack.c.bf16 %v46_v23, %v45_v22  ;;  %v1769_v28 = vpack.c.bf16 %v142_v26, %v141_v25  ;;  %v38_v29 = vld [vmem:[%s2012_s0] sm:$0xff]  ;;  %v143_v30 = vld [vmem:[%s2014_s2 + $0x50] sm:$0xff]  ;;  %v144_v31 = vld [vmem:[%s2014_s2 + $0x58] sm:$0xff] }
  0x1b   :  { %1373 = vmatpush3.bf16.msra.mxu1 %v1736_v11  ;;  %v1783_v32 = vpack.c.bf16 %v144_v31, %v143_v30  ;;  %v145_v33 = vld [vmem:[%s2014_s2 + $0x60] sm:$0xff]  ;;  %v146_v34 = vld [vmem:[%s2014_s2 + $0x68] sm:$0xff]  ;;  %v147_v36 = vld [vmem:[%s2014_s2 + $0x70] sm:$0xff] }
  0x1c   :  { %1374 = vmatprep.subr.bf16.mxu1 %v1663_v0  ;;  %1360 = vmatpush3.bf16.msra.mxu0 %v1359_v15  ;;  %v1797_v35 = vpack.c.bf16 %v146_v34, %v145_v33  ;;  %v148_v37 = vld [vmem:[%s2014_s2 + $0x78] sm:$0xff]  ;;  %v856_v39 = vld [vmem:[%s2015_s3] ss:$0 sm:$0xff]  ;;  %v741_v12 = vld [vmem:[%s2016_s4 + $0x8] sm:$0xff] }
  0x1d   :  { %1361 = vmatprep.subr.bf16.mxu0 %v1663_v0  ;;  %v1809_v38 = vpack.c.bf16 %v148_v37, %v147_v36  ;;  %v742_v13 = vld [vmem:[%s2016_s4 + $0x10] sm:$0xff]  ;;  %v743_v15 = vld [vmem:[%s2016_s4 + $0x18] sm:$0xff]  ;;  %v745_v17 = vld [vmem:[%s2016_s4 + $0x28] sm:$0xff] }
  0x1e   :  { %v1564_v16 = vpack.c.bf16 %v743_v15, %v742_v13  ;;  %v746_v19 = vld [vmem:[%s2016_s4 + $0x30] sm:$0xff]  ;;  %v747_v20 = vld [vmem:[%s2016_s4 + $0x38] sm:$0xff]  ;;  %v748_v22 = vld [vmem:[%s2016_s4 + $0x40] sm:$0xff] }
  0x1f   :  { %1376 = vmatpush3.bf16.msra.mxu1 %v1747_v18  ;;  %v749_v23 = vld [vmem:[%s2016_s4 + $0x48] sm:$0xff]  ;;  %v750_v30 = vld [vmem:[%s2016_s4 + $0x50] sm:$0xff]  ;;  %v751_v31 = vld [vmem:[%s2016_s4 + $0x58] sm:$0xff] }
  0x20   :  { %1377 = vmatprep.subr.bf16.mxu1 %v1663_v0  ;;  %1363 = vmatpush3.bf16.msra.mxu0 %v1362_v21  ;;  %v1570_v21 = vpack.c.bf16 %v747_v20, %v746_v19  ;;  %v752_v33 = vld [vmem:[%s2016_s4 + $0x60] sm:$0xff]  ;;  %v753_v34 = vld [vmem:[%s2016_s4 + $0x68] sm:$0xff]  ;;  %v754_v36 = vld [vmem:[%s2016_s4 + $0x70] sm:$0xff] }
  0x21   :  { %1364 = vmatprep.subr.bf16.mxu0 %v1663_v0  ;;  %v755_v37 = vld [vmem:[%s2016_s4 + $0x78] sm:$0xff] }
  0x23   :  { %1379 = vmatpush3.bf16.msra.mxu1 %v1758_v24 }
  0x24   :  { %1380 = vmatprep.subr.bf16.mxu1 %v1663_v0  ;;  %1367 = vmatpush3.bf16.msk.msra.mxu0 %vm1366_vm3, %v1365_v27 }
  0x25   :  { %1392 = vmatprep.subr.bf16.mxu0 %v1663_v0 }
  0x27   :  { %1382 = vmatpush3.bf16.msra.mxu1 %v1769_v28  ;;  %1038 = vmatmul.mubr.msk.f32.vlgmr.msra.gmra.mrb[0].mxu0 %vm54_vm4, %v38_v29 }
  0x28   :  { %1383 = vmatprep.subr.bf16.mxu1 %v1663_v0  ;;  %1394 = vmatpush3.bf16.msra.mxu0 %v1730_v5 }
  0x29   :  { %1395 = vmatprep.subr.bf16.mxu0 %v1663_v0  ;;  %1107 = vmatprep.mubr.msk.f32.mxu0 %vm1664_vm0, %v1665_v1 }
  0x2b   :  { %1385 = vmatpush3.bf16.msra.mxu1 %v1783_v32 }
  0x2c   :  { %1386 = vmatprep.subr.bf16.mxu1 %v1663_v0  ;;  %1397 = vmatpush3.bf16.msra.mxu0 %v1736_v11 }
  0x2d   :  { %1398 = vmatprep.subr.bf16.mxu0 %v1663_v0 }
  0x2f   :  { %1388 = vmatpush3.bf16.msra.mxu1 %v1797_v35 }
  0x30   :  { %1389 = vmatprep.subr.bf16.mxu1 %v1663_v0  ;;  %1400 = vmatpush3.bf16.msra.mxu0 %v1747_v18 }
  0x31   :  { %1401 = vmatprep.subr.bf16.mxu0 %v1663_v0 }
  0x33   :  { %1391 = vmatpush3.bf16.msra.mxu1 %v1809_v38 }
  0x34   :  { %1403 = vmatpush3.bf16.msra.mxu0 %v1758_v24  ;;  %1416 = vmatprep.subr.bf16.mxu1 %v1663_v0 }
  0x35   :  { %1404 = vmatprep.subr.bf16.mxu0 %v1663_v0 }
  0x36   :  { %1073 = vmatmul.mubr.f32.vlgmr.msra.gmra.mrb[0].mxu1 %v1665_v1 }
  0x37   :  { %1418 = vmatpush3.bf16.msra.mxu1 %v1730_v5  ;;  %1142 = vmatprep.mubr.msk.f32.mxu1 %vm1664_vm0, %v1665_v1 }
  0x38   :  { %1406 = vmatpush3.bf16.msra.mxu0 %v1769_v28  ;;  %1419 = vmatprep.subr.bf16.mxu1 %v1663_v0 }
  0x39   :  { %1407 = vmatprep.subr.bf16.mxu0 %v1663_v0 }
  0x3b   :  { %1421 = vmatpush3.bf16.msra.mxu1 %v1736_v11 }
  0x3c   :  { %1409 = vmatpush3.bf16.msra.mxu0 %v1783_v32  ;;  %1422 = vmatprep.subr.bf16.mxu1 %v1663_v0 }
  0x3d   :  { %1410 = vmatprep.subr.bf16.mxu0 %v1663_v0 }
  0x3f   :  { %1424 = vmatpush3.bf16.msra.mxu1 %v1747_v18 }
  0x40   :  { %1412 = vmatpush3.bf16.msra.mxu0 %v1797_v35  ;;  %1425 = vmatprep.subr.bf16.mxu1 %v1663_v0 }
  0x41   :  { %1413 = vmatprep.subr.bf16.mxu0 %v1663_v0 }
  0x43   :  { %1427 = vmatpush3.bf16.msra.mxu1 %v1758_v24 }
  0x44   :  { %1415 = vmatpush3.bf16.msra.mxu0 %v1809_v38  ;;  %1428 = vmatprep.subr.bf16.mxu1 %v1663_v0 }
  0x45   :  { %1440 = vmatprep.subr.bf16.mxu0 %v1663_v0 }
  0x47   :  { %1430 = vmatpush3.bf16.msra.mxu1 %v1769_v28 }
  0x48   :  { %1431 = vmatprep.subr.bf16.mxu1 %v1663_v0 }
  0x4b   :  { %1433 = vmatpush3.bf16.msra.mxu1 %v1783_v32 }
  0x4c   :  { %1434 = vmatprep.subr.bf16.mxu1 %v1663_v0 }
  0x4f   :  { %1436 = vmatpush3.bf16.msra.mxu1 %v1797_v35 }
  0x50   :  { %1437 = vmatprep.subr.bf16.mxu1 %v1663_v0 }
  0x53   :  { %1439 = vmatpush3.bf16.msra.mxu1 %v1809_v38 }
  0x54   :  { %1464 = vmatprep.subr.bf16.mxu1 %v1663_v0 }
  0xfa   :  { %v128_v40 = vpop.f32.mrb[0].mxu0 }
  0xfb   :  { %v129_v41 = vadd.f32 %v856_v39, %v128_v40  ;;  %v1039_v42 = vpop.f32.mrb[1].mxu0 }
  0xfd   :  { %132 = vst [vmem:[#allocation2] sm:$0xff] %v129_v41 }
 0x104   :  { %v149_v43 = vld [vmem:[#allocation2] sm:$0x1]  ;;  %v223_v48 = vld [vmem:[#allocation2 + $0x1] sm:$0x1]  ;;  %v297_v53 = vld [vmem:[#allocation2 + $0x2] sm:$0x1] }
 0x105   :  { %v371_v58 = vld [vmem:[#allocation2 + $0x3] sm:$0x1]  ;;  %v445_v63 = vld [vmem:[#allocation2 + $0x4] sm:$0x1]  ;;  %v593_v25 = vld [vmem:[#allocation2 + $0x6] sm:$0x1] }
 0x106   :  { %v667_v39 = vld [vmem:[#allocation2 + $0x7] sm:$0x1] }
 0x109   :  { %v216_v44 = vpop.f32.mrb[0].mxu1 }
 0x10a   :  { %v220_v45 = vadd.f32 %v216_v44, %v149_v43  ;;  %v1074_v46 = vpop.f32.mrb[1].mxu1  ;;  %v756_v44 = vld [vmem:[%s2017_s5] sm:$0x1] }
 0x10c   :  { %1592 = vtanh.f32 %v220_v45 }
 0x116   :  { %v1593_v47 = vpop.eup %1592 }
 0x117   :  { %1108 = vmatmul.mubr.f32.vlgmr.msra.gmra.mrb[2].mxu0 %v1593_v47 }
 0x118   :  { %1442 = vmatpush3.bf16.msra.mxu0 %v1730_v5  ;;  %1177 = vmatprep.mubr.msk.f32.mxu0 %vm1664_vm0, %v1665_v1 }
 0x119   :  { %1443 = vmatprep.subr.bf16.mxu0 %v1663_v0 }
 0x11c   :  { %1445 = vmatpush3.bf16.msra.mxu0 %v1736_v11 }
 0x11d   :  { %1446 = vmatprep.subr.bf16.mxu0 %v1663_v0 }
 0x120   :  { %1448 = vmatpush3.bf16.msra.mxu0 %v1747_v18 }
 0x121   :  { %1449 = vmatprep.subr.bf16.mxu0 %v1663_v0 }
 0x124   :  { %1451 = vmatpush3.bf16.msra.mxu0 %v1758_v24 }
 0x125   :  { %1452 = vmatprep.subr.bf16.mxu0 %v1663_v0 }
 0x128   :  { %1454 = vmatpush3.bf16.msra.mxu0 %v1769_v28 }
 0x129   :  { %1455 = vmatprep.subr.bf16.mxu0 %v1663_v0 }
 0x12c   :  { %1457 = vmatpush3.bf16.msra.mxu0 %v1783_v32 }
 0x12d   :  { %1458 = vmatprep.subr.bf16.mxu0 %v1663_v0 }
 0x130   :  { %1460 = vmatpush3.bf16.msra.mxu0 %v1797_v35 }
 0x131   :  { %1461 = vmatprep.subr.bf16.mxu0 %v1663_v0 }
 0x134   :  { %1463 = vmatpush3.bf16.msra.mxu0 %v1809_v38 }
 0x135   :  { %1488 = vmatprep.subr.bf16.mxu0 %v1663_v0 }
 0x1ea   :  { %v290_v49 = vpop.f32.mrb[2].mxu0 }
 0x1eb   :  { %v294_v50 = vadd.f32 %v290_v49, %v223_v48  ;;  %v1109_v51 = vpop.f32.mrb[3].mxu0 }
 0x1ed   :  { %1594 = vtanh.f32 %v294_v50 }
 0x1f7   :  { %v1595_v52 = vpop.eup %1594 }
 0x1f8   :  { %1143 = vmatmul.mubr.f32.vlgmr.msra.gmra.mrb[2].mxu1 %v1595_v52 }
 0x1f9   :  { %1466 = vmatpush3.bf16.msra.mxu1 %v1730_v5  ;;  %1212 = vmatprep.mubr.msk.f32.mxu1 %vm1664_vm0, %v1665_v1 }
 0x1fa   :  { %1467 = vmatprep.subr.bf16.mxu1 %v1663_v0 }
 0x1fd   :  { %1469 = vmatpush3.bf16.msra.mxu1 %v1736_v11 }
 0x1fe   :  { %1470 = vmatprep.subr.bf16.mxu1 %v1663_v0 }
 0x201   :  { %1472 = vmatpush3.bf16.msra.mxu1 %v1747_v18 }
 0x202   :  { %1473 = vmatprep.subr.bf16.mxu1 %v1663_v0 }
 0x205   :  { %1475 = vmatpush3.bf16.msra.mxu1 %v1758_v24 }
 0x206   :  { %1476 = vmatprep.subr.bf16.mxu1 %v1663_v0 }
 0x209   :  { %1478 = vmatpush3.bf16.msra.mxu1 %v1769_v28 }
 0x20a   :  { %1479 = vmatprep.subr.bf16.mxu1 %v1663_v0 }
 0x20d   :  { %1481 = vmatpush3.bf16.msra.mxu1 %v1783_v32 }
 0x20e   :  { %1482 = vmatprep.subr.bf16.mxu1 %v1663_v0 }
 0x211   :  { %1484 = vmatpush3.bf16.msra.mxu1 %v1797_v35 }
 0x212   :  { %1485 = vmatprep.subr.bf16.mxu1 %v1663_v0 }
 0x215   :  { %1487 = vmatpush3.bf16.msra.mxu1 %v1809_v38 }
 0x216   :  { %1512 = vmatprep.subr.bf16.mxu1 %v1663_v0 }
 0x2cb   :  { %v364_v54 = vpop.f32.mrb[2].mxu1 }
 0x2cc   :  { %v368_v55 = vadd.f32 %v364_v54, %v297_v53  ;;  %v1144_v56 = vpop.f32.mrb[3].mxu1 }
 0x2ce   :  { %1596 = vtanh.f32 %v368_v55 }
 0x2d8   :  { %v1597_v57 = vpop.eup %1596 }
 0x2d9   :  { %1178 = vmatmul.mubr.f32.vlgmr.msra.gmra.mrb[4].mxu0 %v1597_v57 }
 0x2da   :  { %1490 = vmatpush3.bf16.msra.mxu0 %v1730_v5  ;;  %1247 = vmatprep.mubr.msk.f32.mxu0 %vm1664_vm0, %v1665_v1 }
 0x2db   :  { %1491 = vmatprep.subr.bf16.mxu0 %v1663_v0 }
 0x2de   :  { %1493 = vmatpush3.bf16.msra.mxu0 %v1736_v11 }
 0x2df   :  { %1494 = vmatprep.subr.bf16.mxu0 %v1663_v0 }
 0x2e2   :  { %1496 = vmatpush3.bf16.msra.mxu0 %v1747_v18 }
 0x2e3   :  { %1497 = vmatprep.subr.bf16.mxu0 %v1663_v0 }
 0x2e6   :  { %1499 = vmatpush3.bf16.msra.mxu0 %v1758_v24 }
 0x2e7   :  { %1500 = vmatprep.subr.bf16.mxu0 %v1663_v0 }
 0x2ea   :  { %1502 = vmatpush3.bf16.msra.mxu0 %v1769_v28 }
 0x2eb   :  { %1503 = vmatprep.subr.bf16.mxu0 %v1663_v0 }
 0x2ee   :  { %1505 = vmatpush3.bf16.msra.mxu0 %v1783_v32 }
 0x2ef   :  { %1506 = vmatprep.subr.bf16.mxu0 %v1663_v0 }
 0x2f2   :  { %1508 = vmatpush3.bf16.msra.mxu0 %v1797_v35 }
 0x2f3   :  { %1509 = vmatprep.subr.bf16.mxu0 %v1663_v0 }
 0x2f6   :  { %1511 = vmatpush3.bf16.msra.mxu0 %v1809_v38 }
 0x2f7   :  { %1536 = vmatprep.subr.bf16.mxu0 %v1663_v0 }
 0x3ac   :  { %v438_v59 = vpop.f32.mrb[4].mxu0 }
 0x3ad   :  { %v442_v60 = vadd.f32 %v438_v59, %v371_v58  ;;  %v1179_v61 = vpop.f32.mrb[5].mxu0 }
 0x3af   :  { %1598 = vtanh.f32 %v442_v60 }
 0x3b9   :  { %v1599_v62 = vpop.eup %1598 }
 0x3ba   :  { %1213 = vmatmul.mubr.f32.vlgmr.msra.gmra.mrb[4].mxu1 %v1599_v62 }
 0x3bb   :  { %1514 = vmatpush3.bf16.msra.mxu1 %v1730_v5  ;;  %1282 = vmatprep.mubr.msk.f32.mxu1 %vm1664_vm0, %v1665_v1 }
 0x3bc   :  { %1515 = vmatprep.subr.bf16.mxu1 %v1663_v0 }
 0x3bf   :  { %1517 = vmatpush3.bf16.msra.mxu1 %v1736_v11 }
 0x3c0   :  { %1518 = vmatprep.subr.bf16.mxu1 %v1663_v0 }
 0x3c3   :  { %1520 = vmatpush3.bf16.msra.mxu1 %v1747_v18 }
 0x3c4   :  { %1521 = vmatprep.subr.bf16.mxu1 %v1663_v0 }
 0x3c7   :  { %1523 = vmatpush3.bf16.msra.mxu1 %v1758_v24 }
 0x3c8   :  { %1524 = vmatprep.subr.bf16.mxu1 %v1663_v0 }
 0x3cb   :  { %1526 = vmatpush3.bf16.msra.mxu1 %v1769_v28 }
 0x3cc   :  { %1527 = vmatprep.subr.bf16.mxu1 %v1663_v0 }
 0x3cf   :  { %1529 = vmatpush3.bf16.msra.mxu1 %v1783_v32 }
 0x3d0   :  { %1530 = vmatprep.subr.bf16.mxu1 %v1663_v0 }
 0x3d3   :  { %1532 = vmatpush3.bf16.msra.mxu1 %v1797_v35 }
 0x3d4   :  { %1533 = vmatprep.subr.bf16.mxu1 %v1663_v0 }
 0x3d7   :  { %1535 = vmatpush3.bf16.msra.mxu1 %v1809_v38 }
 0x3d8   :  { %1560 = vmatprep.subr.bf16.mxu1 %v1663_v0 }
 0x48d   :  { %v512_v2 = vpop.f32.mrb[4].mxu1 }
 0x48e   :  { %v516_v3 = vadd.f32 %v512_v2, %v445_v63  ;;  %v1214_v4 = vpop.f32.mrb[5].mxu1 }
 0x490   :  { %1600 = vtanh.f32 %v516_v3 }
 0x49a   :  { %v1601_v6 = vpop.eup %1600 }
 0x49b   :  { %1248 = vmatmul.mubr.f32.vlgmr.msra.gmra.mrb[6].mxu0 %v1601_v6 }
 0x49c   :  { %1538 = vmatpush3.bf16.msra.mxu0 %v1730_v5  ;;  %1317 = vmatprep.mubr.msk.f32.mxu0 %vm1664_vm0, %v1665_v1  ;;  %v519_v5 = vld [vmem:[#allocation2 + $0x5] sm:$0x1] }
 0x49d   :  { %1539 = vmatprep.subr.bf16.mxu0 %v1663_v0 }
 0x4a0   :  { %1541 = vmatpush3.bf16.msra.mxu0 %v1736_v11  ;;  %v740_v11 = vld [vmem:[%s2016_s4] sm:$0xff] }
 0x4a1   :  { %1542 = vmatprep.subr.bf16.mxu0 %v1663_v0  ;;  %v1561_v14 = vpack.c.bf16 %v741_v12, %v740_v11 }
 0x4a4   :  { %1544 = vmatpush3.bf16.msra.mxu0 %v1747_v18 }
 0x4a5   :  { %1545 = vmatprep.subr.bf16.mxu0 %v1663_v0 }
 0x4a8   :  { %1547 = vmatpush3.bf16.msra.mxu0 %v1758_v24  ;;  %v1573_v24 = vpack.c.bf16 %v749_v23, %v748_v22 }
 0x4a9   :  { %1548 = vmatprep.subr.bf16.mxu0 %v1663_v0 }
 0x4ac   :  { %1550 = vmatpush3.bf16.msra.mxu0 %v1769_v28 }
 0x4ad   :  { %1551 = vmatprep.subr.bf16.mxu0 %v1663_v0 }
 0x4b0   :  { %1553 = vmatpush3.bf16.msra.mxu0 %v1783_v32  ;;  %v1576_v32 = vpack.c.bf16 %v751_v31, %v750_v30 }
 0x4b1   :  { %1554 = vmatprep.subr.bf16.mxu0 %v1663_v0 }
 0x4b4   :  { %1556 = vmatpush3.bf16.msra.mxu0 %v1797_v35  ;;  %v1579_v35 = vpack.c.bf16 %v753_v34, %v752_v33 }
 0x4b5   :  { %1557 = vmatprep.subr.bf16.mxu0 %v1663_v0 }
 0x4b8   :  { %1559 = vmatpush3.bf16.msra.mxu0 %v1809_v38  ;;  %v1582_v38 = vpack.c.bf16 %v755_v37, %v754_v36 }
 0x56e   :  { %v586_v7 = vpop.f32.mrb[6].mxu0 }
 0x56f   :  { %v590_v8 = vadd.f32 %v586_v7, %v519_v5  ;;  %v1249_v9 = vpop.f32.mrb[7].mxu0 }
 0x571   :  { %1602 = vtanh.f32 %v590_v8 }
 0x57b   :  { %v1603_v10 = vpop.eup %1602 }
 0x57c   :  { %1283 = vmatmul.mubr.f32.vlgmr.msra.gmra.mrb[6].mxu1 %v1603_v10 }
 0x57d   :  { %1352 = vmatprep.mubr.msk.f32.mxu1 %vm1664_vm0, %v1665_v1  ;;  %1562 = vmatpush3.bf16.msra.mxu1 %v1561_v14  ;;  %v744_v1 = vld [vmem:[%s2016_s4 + $0x20] sm:$0xff]  ;;  %s1667_s4 = smov [#allocation6]  }
 0x57e   :  { %1563 = vmatprep.subr.bf16.mxu1 %v1663_v0  ;;  %v1567_v18 = vpack.c.bf16 %v745_v17, %v744_v1  ;;  %s847_s5 = sshll.u32 %s1667_s4, 4  ;;  %s848_s5 = int_to_ptr.vmem [resolvable:$true] %s847_s5 }
 0x57f   :  { %s1634_s24 = scalar_lea.vmem %s848_s5, 16  ;;  %s1638_s25 = scalar_lea.vmem %s848_s5, 32 }
 0x580   :  { %p1635_p8 = scmp.ne.s32.totalorder %s848_s5, %s1634_s24  ;;  %p1639_p9 = scmp.lt.s32.totalorder %s848_s5, %s848_s5 }
 0x581   :  { %1565 = vmatpush3.bf16.msra.mxu1 %v1564_v16  ;;  %p1640_p10 = scmp.lt.s32.totalorder %s1638_s25, %s1634_s24 }
 0x582   :  { %1566 = vmatprep.subr.bf16.mxu1 %v1663_v0 }
 0x583   :  { %p1641_p11 = por %p1640_p10, %p1639_p9 }
 0x585   :  { %1568 = vmatpush3.bf16.msra.mxu1 %v1567_v18  ;;  %p1642_p12 = pnand %p1641_p11, %p1635_p8 }
 0x586   :  { %1569 = vmatprep.subr.bf16.mxu1 %v1663_v0 }
 0x589   :  { %1571 = vmatpush3.bf16.msra.mxu1 %v1570_v21 }
 0x58a   :  { %1572 = vmatprep.subr.bf16.mxu1 %v1663_v0 }
 0x58d   :  { %1574 = vmatpush3.bf16.msra.mxu1 %v1573_v24 }
 0x58e   :  { %1575 = vmatprep.subr.bf16.mxu1 %v1663_v0 }
 0x591   :  { %1577 = vmatpush3.bf16.msra.mxu1 %v1576_v32 }
 0x592   :  { %1578 = vmatprep.subr.bf16.mxu1 %v1663_v0 }
 0x595   :  { %1580 = vmatpush3.bf16.msra.mxu1 %v1579_v35 }
 0x596   :  { %1581 = vmatprep.subr.bf16.mxu1 %v1663_v0 }
 0x599   :  { %1583 = vmatpush3.bf16.msra.mxu1 %v1582_v38 }
 0x64f   :  { %v660_v26 = vpop.f32.mrb[6].mxu1 }
 0x650   :  { %v664_v27 = vadd.f32 %v660_v26, %v593_v25  ;;  %v1284_v28 = vpop.f32.mrb[7].mxu1 }
 0x652   :  { %1604 = vtanh.f32 %v664_v27 }
 0x65c   :  { %v1605_v29 = vpop.eup %1604 }
 0x65d   :  { %1318 = vmatmul.mubr.f32.vlgmr.msra.gmra.mrb[8].mxu0 %v1605_v29 }
 0x730   :  { %v734_v40 = vpop.f32.mrb[8].mxu0 }
 0x731   :  { %v738_v41 = vadd.f32 %v734_v40, %v667_v39  ;;  %v1319_v42 = vpop.f32.mrb[9].mxu0 }
 0x733   :  { %1606 = vtanh.f32 %v738_v41 }
 0x73d   :  { %v1607_v43 = vpop.eup %1606 }
 0x73e   :  { %1353 = vmatmul.mubr.f32.vlgmr.msra.gmra.mrb[8].mxu1 %v1607_v43 }
 0x811   :  { %v823_v45 = vpop.f32.mrb[8].mxu1 }
 0x812   :  { %v824_v46 = vadd.f32 %v823_v45, %v756_v44  ;;  %v1354_v47 = vpop.f32.mrb[9].mxu1 }
 0x814   :  { %v828_v48 = vsel %vm827_vm5, %v824_v46, -inf }
 0x815   :  { %829 = vmax.xlane.f32.xlu0 %v828_v48 }
 0x8a2   :  { %v830_v0 = vpop.xlane.xlu0 %829 }
 0x8a3   :  { %v831_v49 = vsub.f32 %v824_v46, %v830_v0 }
 0x8a5   :  { %v832_v50 = vmul.f32 1.442695, %v831_v49 }
 0x8a7   :  { %1608 = vpow2.f32 %v832_v50 }
 0x8b1   :  { %v1609_v51 = vpop.eup %1608 }
 0x8b2   :  { %v834_v52 = vsel %vm827_vm5, %v1609_v51, 0.0 }
 0x8b3   :  { %835 = vadd.xlane.f32.xlu0 %v834_v52 }
 0x940   :  { %v836_v53 = vpop.xlane.xlu0 %835 }
 0x941   :  { %1610 = vlog2.f32 %v836_v53 }
 0x94b   :  { %v1611_v54 = vpop.eup %1610 }
 0x94c   :  { %v838_v55 = vmul.f32 0.6931472, %v1611_v54 }
 0x94e   :  { %v839_v56 = vsub.f32 %v831_v49, %v838_v55 }
 0x950   :  { %840 = vst.msk [vmem:[#allocation6] sm:$0x1] %vm827_vm5, %v839_v56 }
 0x951   :  { %1645 = shalt.err (!%p1642_p12)
}
 0x952   :  { %s1646_s28 = scalar_lea.hbm %s2018_s6, 16 }
 0x953   :  { %p1647_p13 = scmp.ne.s32.totalorder %s2018_s6, %s1646_s28  ;;  %p1650_p0 = scmp.lt.u32.totalorder %s1646_s28, %s2018_s6 }
 0x955   :  { %p1652_p1 = pnand %p1650_p0, %p1647_p13 }
 0x957   :  { %1655 = shalt.err (!%p1652_p1)
}
 0x958   :  { %850 = dma.vmem_to_hbm [thread:$0]  %s848_s5, 16, %s2018_s6, [#allocation5]  }
 0x959   :  { %1658 = dma.done.wait [#allocation5], 16  }
 0x95a   :  { %1659 = vsyncadd [#allocation5], 4294967280 }
 0x95b   :  { %854 = vsyncpa [#allocation4], 1 }
 0x95c   :  { %855 = vsyncpa [#allocation5], 1 }

</bundles_post_ra>
